<compile_context>
chip_gen: v7x
topology: tpu7x:2x2x1
jax: 0.10.0
libtpu: 0.0.40
codegen_flags: <defaults>
</compile_context>

<pallas_src>
import math
import jax
import jax.numpy as jnp
from jax import lax
from jax.experimental import pallas as pl
from jax.experimental.pallas import tpu as pltpu

GMM_COMP = 5
GMM_PARAM = 6
GMM_OUT = GMM_COMP * GMM_PARAM      # 30
PAD_OUT = 128                       # lane-dense output width
XY_X_COL = GMM_OUT                  # col 30 of the output slab
XY_Y_COL = GMM_OUT + 1              # col 31 of the output slab


def _bbox_head_kernel(x_ref, wc_ref, bc_ref, out_ref):
    # x:  (tm, H)   streamed rows (any dtype; cast to the weight dtype below)
    # wc: (H, 128)  folded weight (cols >= 30 zero-padded), compute dtype
    # bc: (1, 128)  folded bias, f32
    # out:(tm, 128) f32 slab: cols 0..29 = raw GMM params, col 30/31 = (x, y)
    x = x_ref[...].astype(wc_ref.dtype)

    # Single fused Linear: f32 accumulation on the MXU, lane-dense 128-wide
    # result -> unmasked full-lane stores.
    g = jnp.dot(x, wc_ref[...], preferred_element_type=jnp.float32) + bc_ref[...]

    # Lane-constant iota: (1, 128) so lane masks are single vregs and broadcast
    # in the where/compare chain (no (tm,128) int32 iota materialized).
    col = lax.broadcasted_iota(jnp.int32, (1, PAD_OUT), 1)
    pi_mask = col < GMM_COMP                       # (1, 128)

    # Component selection over pi = g[:, 0:5]. argmax is invariant under
    # softmax and positive temperature, so the deterministic path is
    # argmax(pi) per row (torch's multinomial-exception fallback).
    pi_vals = jnp.where(pi_mask, g, -jnp.inf)                       # (tm, 128)
    row_max = jnp.max(pi_vals, axis=-1, keepdims=True)              # XLU pass 1
    idx = jnp.min(                                                  # XLU pass 2
        jnp.where(pi_mask & (g >= row_max), col, GMM_COMP),
        axis=-1, keepdims=True)                                     # (tm,1) in [0,5)

    # Greedy sample == mean of the chosen bivariate component.
    sx = jnp.sum(jnp.where(col == idx + GMM_COMP, g, 0.0),
                 axis=-1, keepdims=True)                            # XLU pass 3
    sy = jnp.sum(jnp.where(col == idx + 2 * GMM_COMP, g, 0.0),
                 axis=-1, keepdims=True)                            # XLU pass 4

    # Blend selected means into the lane-dense slab (pure VPU selects).
    slab = jnp.where(col == XY_X_COL, sx, g)
    slab = jnp.where(col == XY_Y_COL, sy, slab)
    out_ref[...] = slab.astype(out_ref.dtype)


def _round_up(a, b):
    return (a + b - 1) // b * b


def prepare_bbox_head_params(w1, b1, w2, b2, *, compute_dtype=jnp.bfloat16):
    """One-time preprocessing (hoisted out of the forward pass).

    Folds output_Layer and xy_bivariate (no nonlinearity between them) into a
    single (H, 128) weight + (1, 128) bias, zero-padded past column 30.
    Weights are stored (in, out) == torch W^T. Fold is done in f32 HIGHEST
    precision; only the folded weight is cast to `compute_dtype`.
    """
    w1f, b1f = w1.astype(jnp.float32), b1.astype(jnp.float32)
    w2f, b2f = w2.astype(jnp.float32), b2.astype(jnp.float32)
    wc = jnp.dot(w1f, w2f, precision=lax.Precision.HIGHEST)          # (H, 30)
    bc = jnp.dot(b1f, w2f, precision=lax.Precision.HIGHEST) + b2f    # (1, 30)
    wc = jnp.pad(wc, ((0, 0), (0, PAD_OUT - GMM_OUT)))
    bc = jnp.pad(bc, ((0, 0), (0, PAD_OUT - GMM_OUT)))
    return wc.astype(compute_dtype), bc.astype(jnp.float32)


def bbox_head_forward(encoder_output, wc, bc, *, tile_rows=None):
    """encoder_output: (B, L, H). (wc, bc) from prepare_bbox_head_params.
    For full bf16 bandwidth benefit pass encoder_output already in bf16.
    Returns (coarse_xy, coarse_xy_gmm, None, None)."""
    B, L, H = encoder_output.shape
    assert wc.shape == (H, PAD_OUT) and bc.shape == (1, PAD_OUT)
    M = B * L

    try:
        vmem_cap = int(pltpu.get_tpu_info().vmem_capacity_bytes)
    except Exception:
        vmem_cap = 64 << 20   # v7x per-TC VMEM as the conservative fallback

    # Bigger row tiles on 128 MiB-VMEM parts (v5e/v6e); 512 for v7x.
    if tile_rows is None:
        tile_rows = 1024 if vmem_cap >= (96 << 20) else 512

    x = encoder_output.reshape(M, H)
    x_elt = jnp.dtype(x.dtype).itemsize
    w_elt = jnp.dtype(wc.dtype).itemsize

    # Row alignment: 8 for f32 rows, 16 for bf16 (two rows per packed sublane).
    align = max(8, 32 // max(x_elt, 1))
    if M <= align:
        tm = align                       # tiny input: a single small tile
    else:
        # At least 2 grid steps so the "parallel" axis spans both v7x TCs.
        tm = min(tile_rows, _round_up(-(-M // 2), align))
    Mp = _round_up(M, tm)
    if Mp != M:
        x = jnp.pad(x, ((0, Mp - M), (0, 0)))   # zero rows; sliced off below

    # VMEM budget: double-buffered x tile + output slab, resident folded
    # weight/bias (budgeted at 2 buffers), plus f32 g / epilogue temporaries.
    need = (2 * tm * H * x_elt
            + 2 * (H * PAD_OUT * w_elt + PAD_OUT * 4)
            + 2 * tm * PAD_OUT * 4
            + 4 * tm * PAD_OUT * 4)
    vmem_limit = int(min(max(2 * need, 8 << 20), int(vmem_cap * 0.9)))

    cost = pl.CostEstimate(
        flops=2 * Mp * H * PAD_OUT,
        transcendentals=0,
        bytes_accessed=(Mp * H * x_elt + H * PAD_OUT * w_elt
                        + PAD_OUT * 4 + Mp * PAD_OUT * 4),
    )

    out = pl.pallas_call(
        _bbox_head_kernel,
        out_shape=jax.ShapeDtypeStruct((Mp, PAD_OUT), jnp.float32),
        grid_spec=pltpu.PrefetchScalarGridSpec(
            num_scalar_prefetch=0,
            grid=(Mp // tm,),
            in_specs=[
                pl.BlockSpec((tm, H), lambda i: (i, 0)),        # streamed rows
                pl.BlockSpec((H, PAD_OUT), lambda i: (0, 0)),   # folded weight
                pl.BlockSpec((1, PAD_OUT), lambda i: (0, 0)),   # folded bias
            ],
            out_specs=pl.BlockSpec((tm, PAD_OUT), lambda i: (i, 0)),
        ),
        compiler_params=pltpu.CompilerParams(
            dimension_semantics=("parallel",),   # rows shard across v7x TCs
            vmem_limit_bytes=vmem_limit,
        ),
        cost_estimate=cost,
    )(x, wc, bc)

    coarse_xy_gmm = out[:M, :GMM_OUT].reshape(B, L, GMM_OUT)
    coarse_xy = out[:M, XY_X_COL:XY_Y_COL + 1].reshape(B, L, 2)
    return coarse_xy, coarse_xy_gmm, None, None


def init_params(key, hidden_size):
    """Deterministic nn.Linear-style init: U(-1/sqrt(fan_in), 1/sqrt(fan_in))."""
    k1, k2, k3, k4 = jax.random.split(key, 4)
    bound = 1.0 / math.sqrt(hidden_size)
    w1 = jax.random.uniform(k1, (hidden_size, hidden_size), jnp.float32, -bound, bound)
    b1 = jax.random.uniform(k2, (1, hidden_size), jnp.float32, -bound, bound)
    w2 = jax.random.uniform(k3, (hidden_size, GMM_OUT), jnp.float32, -bound, bound)
    b2 = jax.random.uniform(k4, (1, GMM_OUT), jnp.float32, -bound, bound)
    return w1, b1, w2, b2


def _jax_reference(encoder_output, w1, b1, w2, b2):
    """Unfolded two-Linear reference (f32, HIGHEST precision)."""
    B, L, H = encoder_output.shape
    x = encoder_output.reshape(-1, H).astype(jnp.float32)
    h = jnp.dot(x, w1, precision=lax.Precision.HIGHEST) + b1
    g = jnp.dot(h, w2, precision=lax.Precision.HIGHEST) + b2
    idx = jnp.argmax(g[:, :GMM_COMP], axis=-1)
    rx = jnp.take_along_axis(g[:, GMM_COMP:2 * GMM_COMP], idx[:, None], axis=1)
    ry = jnp.take_along_axis(g[:, 2 * GMM_COMP:3 * GMM_COMP], idx[:, None], axis=1)
    xy = jnp.concatenate([rx, ry], axis=-1).reshape(B, L, 2)
    return xy, g.reshape(B, L, GMM_OUT)


if __name__ == "__main__":
    key = jax.random.PRNGKey(0)
    k_in, k_par, k_in2 = jax.random.split(key, 3)

    B, L, H = 2, 8, 32   # batch, sequence, hidden
    encoder_output = jax.random.normal(k_in, (B, L, H), jnp.float32)
    w1, b1, w2, b2 = init_params(k_par, H)
    ref_xy, ref_gmm = _jax_reference(encoder_output, w1, b1, w2, b2)

    # --- f32 compute path, tight reference check -----------------------------
    wc32, bc32 = prepare_bbox_head_params(w1, b1, w2, b2, compute_dtype=jnp.float32)
    coarse_xy, coarse_xy_gmm, _, _ = bbox_head_forward(encoder_output, wc32, bc32)
    jax.block_until_ready((coarse_xy, coarse_xy_gmm))
    assert coarse_xy.shape == (B, L, 2)
    assert coarse_xy_gmm.shape == (B, L, GMM_OUT)
    assert jnp.allclose(coarse_xy_gmm, ref_gmm, atol=5e-5), \
        float(jnp.max(jnp.abs(coarse_xy_gmm - ref_gmm)))
    assert jnp.allclose(coarse_xy, ref_xy, atol=5e-5)

    # --- odd row count (exercises the pad/slice + multi-step grid path) ------
    B2, L2 = 3, 5
    enc2 = jax.random.normal(k_in2, (B2, L2, H), jnp.float32)
    xy2, gmm2, _, _ = bbox_head_forward(enc2, wc32, bc32)
    jax.block_until_ready((xy2, gmm2))
    ref_xy2, ref_gmm2 = _jax_reference(enc2, w1, b1, w2, b2)
    assert jnp.allclose(gmm2, ref_gmm2, atol=5e-5)
    assert jnp.allclose(xy2, ref_xy2, atol=5e-5)

    # --- default (bf16) compute path: bf16 inputs, f32 MXU accumulation ------
    wc_bf, bc_bf = prepare_bbox_head_params(w1, b1, w2, b2)   # default bf16
    xy_bf, gmm_bf, _, _ = bbox_head_forward(encoder_output.astype(jnp.bfloat16),
                                            wc_bf, bc_bf)
    jax.block_until_ready((xy_bf, gmm_bf))
    assert jnp.allclose(gmm_bf, ref_gmm, atol=5e-2, rtol=5e-2)
    # Internal consistency: the selected means must match an argmax gather on
    # the kernel's own GMM output (robust to bf16 vs f32 matmul differences).
    gk = gmm_bf.reshape(-1, GMM_OUT)
    idx_k = jnp.argmax(gk[:, :GMM_COMP], axis=-1)
    kx = jnp.take_along_axis(gk[:, GMM_COMP:2 * GMM_COMP], idx_k[:, None], axis=1)
    ky = jnp.take_along_axis(gk[:, 2 * GMM_COMP:3 * GMM_COMP], idx_k[:, None], axis=1)
    assert jnp.allclose(xy_bf.reshape(-1, 2),
                        jnp.concatenate([kx, ky], axis=-1), atol=1e-6)

    print("KERNEL_OK")
</pallas_src>

<mosaic_0001>
module attributes {stable_mosaic.version = 11 : i64} {
  func.func @_bbox_head_kernel(%arg0: i32, %arg1: memref<8x32xf32, #tpu.memory_space<vmem>>, %arg2: memref<32x128xf32, #tpu.memory_space<vmem>>, %arg3: memref<1x128xf32, #tpu.memory_space<vmem>>, %arg4: memref<8x128xf32, #tpu.memory_space<vmem>>) attributes {dimension_semantics = [#tpu.dimension_semantics<parallel>], iteration_bounds = array<i64: 2>, scalar_prefetch = 0 : i64, scratch_operands = 0 : i64, tpu.core_type = #tpu.core_type<tc>, window_params = [{transform_indices = @transform_0, window_bounds = array<i64: 8, 32>}, {pipeline_mode = #tpu.pipeline_mode<synchronous>, transform_indices = @transform_1, window_bounds = array<i64: 32, 128>}, {pipeline_mode = #tpu.pipeline_mode<synchronous>, transform_indices = @transform_2, window_bounds = array<i64: 1, 128>}, {transform_indices = @transform_3, window_bounds = array<i64: 8, 128>}]} {
    %c0 = arith.constant 0 : index
    %c0_0 = arith.constant 0 : index
    %0 = vector.load %arg1[%c0, %c0_0] : memref<8x32xf32, #tpu.memory_space<vmem>>, vector<8x32xf32>
    %c0_1 = arith.constant 0 : index
    %c0_2 = arith.constant 0 : index
    %1 = vector.load %arg2[%c0_1, %c0_2] : memref<32x128xf32, #tpu.memory_space<vmem>>, vector<32x128xf32>
    %cst = arith.constant dense<0.000000e+00> : vector<8x128xf32>
    %2 = tpu.matmul %0, %1, %cst {dimension_numbers = #tpu.dot_dimension_numbers<[1], [0], [0], [1], [0, 0, 1, 1], [], []>} : vector<8x32xf32>, vector<32x128xf32>, vector<8x128xf32> -> vector<8x128xf32>
    %c0_3 = arith.constant 0 : index
    %c0_4 = arith.constant 0 : index
    %3 = vector.load %arg3[%c0_3, %c0_4] : memref<1x128xf32, #tpu.memory_space<vmem>>, vector<1x128xf32>
    %4 = vector.broadcast %3 : vector<1x128xf32> to vector<8x128xf32>
    %5 = arith.addf %2, %4 : vector<8x128xf32>
    %6 = tpu.iota {dimensions = array<i32: 1>} : vector<1x128xi32>
    %c5_i32 = arith.constant 5 : i32
    %7 = vector.broadcast %c5_i32 : i32 to vector<1x128xi32>
    %8 = arith.cmpi slt, %6, %7 : vector<1x128xi32>
    %cst_5 = arith.constant 0xFF800000 : f32
    %9 = vector.shape_cast %8 : vector<1x128xi1> to vector<1x128xi1>
    %10 = vector.broadcast %9 : vector<1x128xi1> to vector<8x128xi1>
    %11 = vector.broadcast %cst_5 : f32 to vector<8x128xf32>
    %12 = arith.select %10, %5, %11 : vector<8x128xi1>, vector<8x128xf32>
    %cst_6 = arith.constant dense<0xFF800000> : vector<8xf32>
    %13 = vector.multi_reduction <maximumf>, %12, %cst_6 [1] : vector<8x128xf32> to vector<8xf32>
    %14 = vector.shape_cast %13 : vector<8xf32> to vector<8x1xf32>
    %15 = vector.broadcast %14 : vector<8x1xf32> to vector<8x128xf32>
    %16 = arith.cmpf oge, %5, %15 : vector<8x128xf32>
    %17 = vector.broadcast %8 : vector<1x128xi1> to vector<8x128xi1>
    %18 = arith.andi %17, %16 : vector<8x128xi1>
    %c5_i32_7 = arith.constant 5 : i32
    %19 = vector.shape_cast %6 : vector<1x128xi32> to vector<1x128xi32>
    %20 = vector.broadcast %19 : vector<1x128xi32> to vector<8x128xi32>
    %21 = vector.broadcast %c5_i32_7 : i32 to vector<8x128xi32>
    %22 = arith.select %18, %20, %21 : vector<8x128xi1>, vector<8x128xi32>
    %cst_8 = arith.constant dense<2147483647> : vector<8xi32>
    %23 = vector.multi_reduction <minsi>, %22, %cst_8 [1] : vector<8x128xi32> to vector<8xi32>
    %24 = vector.shape_cast %23 : vector<8xi32> to vector<8x1xi32>
    %c5_i32_9 = arith.constant 5 : i32
    %25 = vector.broadcast %c5_i32_9 : i32 to vector<8x1xi32>
    %26 = arith.addi %24, %25 : vector<8x1xi32>
    %27 = vector.broadcast %6 : vector<1x128xi32> to vector<8x128xi32>
    %28 = vector.broadcast %26 : vector<8x1xi32> to vector<8x128xi32>
    %29 = arith.cmpi eq, %27, %28 : vector<8x128xi32>
    %cst_10 = arith.constant 0.000000e+00 : f32
    %30 = vector.broadcast %cst_10 : f32 to vector<8x128xf32>
    %31 = arith.select %29, %5, %30 : vector<8x128xi1>, vector<8x128xf32>
    %cst_11 = arith.constant dense<0.000000e+00> : vector<8xf32>
    %32 = vector.multi_reduction <add>, %31, %cst_11 [1] : vector<8x128xf32> to vector<8xf32>
    %33 = vector.shape_cast %32 : vector<8xf32> to vector<8x1xf32>
    %c10_i32 = arith.constant 10 : i32
    %34 = vector.broadcast %c10_i32 : i32 to vector<8x1xi32>
    %35 = arith.addi %24, %34 : vector<8x1xi32>
    %36 = vector.broadcast %6 : vector<1x128xi32> to vector<8x128xi32>
    %37 = vector.broadcast %35 : vector<8x1xi32> to vector<8x128xi32>
    %38 = arith.cmpi eq, %36, %37 : vector<8x128xi32>
    %cst_12 = arith.constant 0.000000e+00 : f32
    %39 = vector.broadcast %cst_12 : f32 to vector<8x128xf32>
    %40 = arith.select %38, %5, %39 : vector<8x128xi1>, vector<8x128xf32>
    %cst_13 = arith.constant dense<0.000000e+00> : vector<8xf32>
    %41 = vector.multi_reduction <add>, %40, %cst_13 [1] : vector<8x128xf32> to vector<8xf32>
    %42 = vector.shape_cast %41 : vector<8xf32> to vector<8x1xf32>
    %c30_i32 = arith.constant 30 : i32
    %43 = vector.broadcast %c30_i32 : i32 to vector<1x128xi32>
    %44 = arith.cmpi eq, %6, %43 : vector<1x128xi32>
    %45 = vector.shape_cast %44 : vector<1x128xi1> to vector<1x128xi1>
    %46 = vector.broadcast %45 : vector<1x128xi1> to vector<8x128xi1>
    %47 = vector.shape_cast %33 : vector<8x1xf32> to vector<8x1xf32>
    %48 = vector.broadcast %47 : vector<8x1xf32> to vector<8x128xf32>
    %49 = arith.select %46, %48, %5 : vector<8x128xi1>, vector<8x128xf32>
    %c31_i32 = arith.constant 31 : i32
    %50 = vector.broadcast %c31_i32 : i32 to vector<1x128xi32>
    %51 = arith.cmpi eq, %6, %50 : vector<1x128xi32>
    %52 = vector.shape_cast %51 : vector<1x128xi1> to vector<1x128xi1>
    %53 = vector.broadcast %52 : vector<1x128xi1> to vector<8x128xi1>
    %54 = vector.shape_cast %42 : vector<8x1xf32> to vector<8x1xf32>
    %55 = vector.broadcast %54 : vector<8x1xf32> to vector<8x128xf32>
    %56 = arith.select %53, %55, %49 : vector<8x128xi1>, vector<8x128xf32>
    %c0_14 = arith.constant 0 : index
    %c0_15 = arith.constant 0 : index
    %57 = vector.load %arg4[%c0_14, %c0_15] : memref<8x128xf32, #tpu.memory_space<vmem>>, vector<8x128xf32>
    tpu.vector_store %arg4[%c0_14, %c0_15], %56 {strides = array<i32>} : memref<8x128xf32, #tpu.memory_space<vmem>>, vector<8x128xf32>,
    return
  }
  func.func @transform_0(%arg0: i32) -> (i32, i32) {
    %c0_i32 = arith.constant 0 : i32
    %c0_i32_0 = arith.constant 0 : i32
    return %arg0, %c0_i32 : i32, i32
  }
  func.func @transform_1(%arg0: i32) -> (i32, i32) {
    %c0_i32 = arith.constant 0 : i32
    %c0_i32_0 = arith.constant 0 : i32
    %c0_i32_1 = arith.constant 0 : i32
    return %c0_i32, %c0_i32_0 : i32, i32
  }
  func.func @transform_2(%arg0: i32) -> (i32, i32) {
    %c0_i32 = arith.constant 0 : i32
    %c0_i32_0 = arith.constant 0 : i32
    %c0_i32_1 = arith.constant 0 : i32
    return %c0_i32, %c0_i32_0 : i32, i32
  }
  func.func @transform_3(%arg0: i32) -> (i32, i32) {
    %c0_i32 = arith.constant 0 : i32
    %c0_i32_0 = arith.constant 0 : i32
    return %arg0, %c0_i32 : i32, i32
  }
}

</mosaic_0001>

<bundles_post_ra>
// kernel: tpu_custom_call.1
= control target key start
LH: loop header
LB: loop body
LE: loop exit
PB: predicated region body
PF: predicated region fallthrough
CT: control target
= control target key end

     0   :  { %8 = vsyncpa [#allocation3], 0  ;;  %s886_s0 = inlined_call_operand.hbm [shape: f32[16,32], index: 0, kind: input, shape index: {}]   ;;  %s887_s1 = inlined_call_operand.hbm [shape: f32[32,128], index: 1, kind: input, shape index: {}]   ;;  %s888_s2 = inlined_call_operand.vmem [shape: f32[1,128], index: 2, kind: input, shape index: {}]   ;;  %s889_s3 = inlined_call_operand.hbm [shape: f32[16,128], index: 3, kind: output, shape index: {}]  }
   0x1   :  { %10 = vsyncpa [#allocation3 + $0x1], 0 }
   0x2   :  { %11 = vsyncpa [#allocation6], 0 }
   0x3   :  { %12 = vsyncpa [#allocation4], 0 }
   0x4   :  { %14 = vsyncpa [#allocation4 + $0x1], 0  ;;  %s683_s12 = smov 0   ;;  %s685_s13 = smov 0  }
   0x5   :  { %s687_s14 = smov 0   ;;  %s689_s15 = smov 0  }
   0x6 LB: > { %s704_s16 = sadd.s32 4294967295, %s653_s15   ;;  %s425_s17 = sadd.s32 4294967294, %s653_s15   ;;  %s653_s15 = sphi %s689_s15, %s909_s15   ;;  %s649_s14 = sphi %s687_s14, %s908_s14   ;;  %s645_s13 = sphi %s685_s13, %s907_s13   ;;  %s641_s12 = sphi %s683_s12, %s906_s12  }
   0x7   : > { %p40_p0 = scmp.ne.s32.totalorder %s645_s13, %s641_s12  ;;  %p890_p1 = scmp.eq.s32.totalorder %s704_s16, 0 }
   0x8   : > { %p112_p3 = scmp.eq.s32.totalorder %s425_s17, 1  ;;  %p426_p5 = scmp.ge.s32.totalorder %s653_s15, 1 }
   0x9   : > { %p713_p4 = por %p890_p1, %p40_p0  ;;  %p119_p7 = scmp.lt.s32.totalorder %s653_s15, 3 }
   0xa   : > { %p718_p6 = por %p112_p3, %p40_p0  ;;  %s655_s21 = smov [#allocation5]  }
   0xb   : > { %s893_s18 = scalar_select %p713_p4, 1, 0 }
   0xc   : > { %s894_s19 = scalar_select %p718_p6, 1, 0 }
   0xd   : > { %p723_p8 = pnand %p426_p5, %p119_p7  ;;  %s131_s22 = sshll.u32 %s655_s21, 4  ;;  %s727_s22 = int_to_ptr.vmem [resolvable:$true] %s131_s22 }
   0xe   : > { %s739_s24 = sadd.s32 1, %s653_s15   ;;  %s27_s25 = sadd.s32 1, %s649_s14 }
   0xf   : > { %s895_s20 = scalar_select %p723_p8, 1, 0 }
  0x10   : > { %p471_p9 = pneg %p723_p8  ;;  %s24_s26 = ssub.s32 %s653_s15, %s739_s24 }
  0x11   : > { %s525_s29 = scalar_lea.hbm %s887_s1, 512 }
  0x12   : > { %p734_p11 = pnand %p471_p9, %p890_p1  ;;  %p526_p12 = scmp.ne.s32.totalorder %s887_s1, %s525_s29 }
  0x13   : > { %p532_p5 = scmp.lt.u32.totalorder %s525_s29, %s887_s1 }
  0x14   : > { %p527_p13 = pneg %p734_p11 }
  0x16   : > { %p528_p0 = pnand %p527_p13, %p526_p12 }
  0x18   : > { %p529_p3 = pneg %p528_p0 }
  0x1a   : > { %p534_p7 = pnand %p532_p5, %p529_p3 }
  0x1c   : > { %537 = shalt.err (!%p534_p7)
}
  0x1d   : > { %s538_s7 = scalar_lea.vmem %s727_s22, 512  ;;  %p546_p2 = scmp.lt.s32.totalorder %s727_s22, %s727_s22 }
  0x1e   : > { %p539_p9 = scmp.ne.s32.totalorder %s727_s22, %s538_s7  ;;  %p547_p6 = scmp.lt.s32.totalorder %s538_s7, %s538_s7 }
  0x20   : > { %p541_p10 = pnand %p539_p9, %p527_p13  ;;  %p548_p4 = por %p547_p6, %p546_p2 }
  0x22   : > { %p542_p1 = pneg %p541_p10 }
  0x24   : > { %p549_p8 = pnand %p548_p4, %p542_p1 }
  0x26   : > { %552 = shalt.err (!%p549_p8)
}
  0x27   : > { %s656_s8 = smov 128   ;;  %s657_s9 = smov 8  }
  0x28   : > { %474 = dma.hbm_to_vmem [thread:$0]  (!%p734_p11), %s887_s1, 512, %s727_s22, [#allocation6], %s656_s8, %s656_s8, %s657_s9  }
  0x29   : > { %p25_p2 = scmp.eq.s32.totalorder %s24_s26, 0  ;;  %p34_p1 = scmp.ne.s32.totalorder %s649_s14, %s645_s13 }
  0x2a   : > { %p35_p4 = scmp.eq.s32.totalorder %s653_s15, 0  ;;  %p484_p6 = scmp.lt.s32.totalorder %s653_s15, 2 }
  0x2b   : > { %s770_s17 = scalar_select %p25_p2, %s649_s14, %s27_s25  }
  0x2c   : > { %p36_p8 = por %p35_p4, %p34_p1  ;;  %p897_p10 = scmp.eq.s32.totalorder %s704_s16, 1 }
  0x2d   : > { %s148_s27 = sand.u32 1, %s649_s14   ;;  %s430_s28 = sshll.u32 %s653_s15, 7 }
  0x2e   : > { %p774_p12 = por %p897_p10, %p34_p1  ;;  %s429_s29 = sshll.u32 %s148_s27, 3 }
  0x2f   : > { %s783_s4 = scalar_lea.hbm %s886_s0, %s430_s28  ;;  %s152_s22 = scalar_lea.vmem [#allocation2], %s429_s29 }
  0x30   : > { %s159_s25 = sshll.u32 %s152_s22, 4  ;;  %p785_p11 = pnand %p484_p6, %p36_p8  ;;  %s789_s25 = int_to_ptr.vmem [resolvable:$true] %s159_s25 }
  0x31   : > { %s149_s5 = scalar_lea.sflag [#allocation3], %s148_s27  ;;  %s553_s6 = scalar_lea.hbm %s783_s4, 128 }
  0x32   : > { %p554_p13 = scmp.ne.s32.totalorder %s783_s4, %s553_s6  ;;  %p555_p0 = pneg %p785_p11 }
  0x33   : > { %s558_s9 = scalar_lea.hbm %s886_s0, 256  ;;  %p559_p7 = scmp.lt.u32.totalorder %s783_s4, %s886_s0 }
  0x34   : > { %p556_p3 = pnand %p555_p0, %p554_p13  ;;  %p560_p9 = scmp.lt.u32.totalorder %s558_s9, %s553_s6 }
  0x35   : > { %p562_p1 = scmp.lt.u32.totalorder %s553_s6, %s783_s4 }
  0x36   : > { %p557_p5 = pneg %p556_p3  ;;  %p561_p2 = por %p560_p9, %p559_p7 }
  0x38   : > { %p563_p4 = por %p562_p1, %p561_p2 }
  0x3a   : > { %p564_p6 = pnand %p563_p4, %p557_p5 }
  0x3c   : > { %567 = shalt.err (!%p564_p6)
}
  0x3d   : > { %s568_s27 = scalar_lea.vmem %s789_s25, 128  ;;  %s658_s28 = smov [#allocation2]  }
  0x3e   : > { %p569_p8 = scmp.ne.s32.totalorder %s789_s25, %s568_s27  ;;  %s573_s29 = sshll.u32 %s658_s28, 4  ;;  %s574_s29 = int_to_ptr.vmem [resolvable:$false] %s573_s29 }
  0x3f   : > { %s575_s23 = scalar_lea.vmem %s574_s29, 256  ;;  %p576_p3 = scmp.lt.s32.totalorder %s789_s25, %s574_s29 }
  0x40   : > { %p571_p10 = pnand %p569_p8, %p555_p0  ;;  %p577_p7 = scmp.lt.s32.totalorder %s575_s23, %s568_s27 }
  0x42   : > { %p572_p13 = pneg %p571_p10  ;;  %p578_p9 = por %p577_p7, %p576_p3 }
  0x44   : > { %p579_p2 = pnand %p578_p9, %p572_p13 }
  0x46   : > { %582 = shalt.err (!%p579_p2)
}
  0x47   : > { %478 = dma.hbm_to_vmem [thread:$0]  (!%p785_p11), %s783_s4, 128, %s789_s25, %s149_s5  }
  0x48   : > { %p900_p5 = scmp.ne.s32.totalorder %s895_s20, 0 }
  0x49   : > { %s819_s30 = sand.u32 (!%p900_p5), 1, %s645_s13   ;;  %p901_p0 = scmp.ne.s32.totalorder (!%p900_p5), %s893_s18, 0 }
  0x4a   : > { %168 = sbr.rel (%p900_p5) target bundleno = 911 (0x38f), region = 32  ;;  %s432_s22 = sshll.u32 (!%p900_p5), %s819_s30, 3 }
  0x4b   : > { %s171_s6 = scalar_lea.sflag (!%p900_p5), [#allocation3], %s819_s30  ;;  %s174_s7 = scalar_lea.vmem (!%p900_p5), [#allocation2], %s432_s22 }
  0x51   : > { %628 = dma.done.wait (%p901_p0), %s171_s6, 128  }
  0x52   : > { %630 = vsyncadd (%p901_p0), %s171_s6, 4294967168  ;;  %p902_p11 = scmp.eq.s32.totalorder %s704_s16, 0 }
  0x54   : > { %632 = dma.done.wait (%p902_p11), [#allocation6], 512   ;;  %p903_p1 = pmov %p902_p11 }
  0x55   : > { %v659_v0 = vmov 0.0|0.0   ;;  %vm660_vm0 = vmmov 0   ;;  %v661_v1 = vmov 0.0   ;;  %v202_v2 = vld [vmem:[#allocation5] sm:$0xff]  ;;  %v203_v3 = vld [vmem:[#allocation5 + $0x8] sm:$0xff]  ;;  %v204_v4 = vld [vmem:[#allocation5 + $0x10] sm:$0xff]  ;;  %v287_v9 = vlaneseq }
  0x56   : > { %634 = vsyncadd (%p903_p1), [#allocation6], 4294966784  ;;  %457 = vmatprep.subr.bf16.mxu0 %v659_v0  ;;  %454 = vmatprep.mubr.msk.f32.mxu0 %vm660_vm0, %v661_v1  ;;  %v458_v5 = vpack.c.bf16 %v203_v3, %v202_v2  ;;  %v205_v6 = vld [vmem:[#allocation5 + $0x18] sm:$0xff]  ;;  %vm213_vm1 = vcmask 261120   ;;  %v435_v11 = vld [vmem:[%s888_s2] ss:$0 sm:$0xff] }
  0x57   : > { %v461_v7 = vpack.c.bf16 %v205_v6, %v204_v4  ;;  %v201_v8 = vld [vmem:[%s174_s7] sm:$0xff]  ;;  %v288_v10 = vand.u32 127, %v287_v9  ;;  %s438_s4 = sshll.u32 %s704_s16, 7  ;;  %s200_s25 = scalar_lea.vmem [#allocation7], %s432_s22 }
  0x58   : > { %459 = vmatpush3.bf16.msra.mxu0 %v458_v5  ;;  %s345_s26 = sshll.u32 %s200_s25, 4  ;;  %s842_s9 = scalar_lea.hbm %s889_s3, %s438_s4  ;;  %s844_s26 = int_to_ptr.vmem [resolvable:$true] %s345_s26 }
  0x59   : > { %460 = vmatprep.subr.bf16.mxu0 %v659_v0  ;;  %vm289_vm2 = vcmp.lt.s32.totalorder %v288_v10, 5  ;;  %vm322_vm8 = vcmp.eq.s32.totalorder %v288_v10, 30  ;;  %vm326_vm9 = vcmp.eq.s32.totalorder %v288_v10, 31  ;;  %s332_s16 = scalar_lea.sflag [#allocation4], %s819_s30  ;;  %s583_s10 = scalar_lea.vmem %s844_s26, 128 }
  0x5a   : > { %p584_p4 = scmp.ne.s32.totalorder %s844_s26, %s583_s10  ;;  %s662_s11 = smov [#allocation7]  }
  0x5b   : > { %s587_s27 = sshll.u32 %s662_s11, 4  ;;  %s588_s27 = int_to_ptr.vmem [resolvable:$false] %s587_s27 }
  0x5c   : > { %462 = vmatpush3.bf16.msra.mxu0 %v461_v7  ;;  %p585_p6 = pnand %p584_p4, %p774_p12  ;;  %s589_s28 = scalar_lea.vmem %s588_s27, 256 }
  0x5d   : > { %p590_p10 = scmp.lt.s32.totalorder %s844_s26, %s588_s27  ;;  %p591_p13 = scmp.lt.s32.totalorder %s589_s28, %s583_s10 }
  0x5e   : > { %p586_p8 = pneg %p585_p6 }
  0x5f   : > { %455 = vmatmul.mubr.msk.f32.vlgmr.msra.gmra.mrb[0].mxu0 %vm213_vm1, %v201_v8  ;;  %p592_p3 = por %p591_p13, %p590_p10 }
  0x61   : > { %p593_p7 = pnand %p592_p3, %p586_p8 }
 0x132   : > { %v283_v12 = vpop.f32.mrb[0].mxu0 }
 0x133   : > { %v284_v13 = vadd.f32 %v435_v11, %v283_v12  ;;  %v456_v14 = vpop.f32.mrb[1].mxu0 }
 0x135   : > { %v292_v15 = vsel %vm289_vm2, %v284_v13, -inf }
 0x136   : > { %293 = vmax.xlane.f32.xlu0 %v292_v15 }
 0x1c3   : > { %v294_v16 = vpop.xlane.xlu0 %293 }
 0x1c4   : > { %vm295_vm3 = vcmp.ge.f32.partialorder %v284_v13, %v294_v16 }
 0x1c5   : > { %vm296_vm4 = vmand %vm289_vm2, %vm295_vm3 }
 0x1c6   : > { %v297_v17 = vsel %vm296_vm4, %v288_v10, 5 }
 0x1c7   : > { %v299_v18 = vshra.s32 %v297_v17, 16  ;;  %v298_v20 = vand.u32 65535, %v297_v17 }
 0x1c9   : > { %v301_v19 = vcvt.s32.f32 %v299_v18  ;;  %v300_v22 = vcvt.s32.f32 %v298_v20 }
 0x1cb   : > { %302 = vmin.xlane.f32.xlu0 %v301_v19 }
 0x258   : > { %v303_v21 = vpop.xlane.xlu0 %302 }
 0x259   : > { %vm304_vm5 = vcmp.eq.f32.partialorder %v301_v19, %v303_v21  ;;  %v309_v24 = vcvt.f32.s32 %v303_v21 }
 0x25a   : > { %v305_v23 = vsel %vm304_vm5, %v300_v22, inf }
 0x25b   : > { %306 = vmin.xlane.f32.xlu1 %v305_v23  ;;  %v310_v26 = vshll.u32 %v309_v24, 16 }
 0x2e8   : > { %v307_v25 = vpop.xlane.xlu1 %306 }
 0x2e9   : > { %v308_v27 = vcvt.f32.s32 %v307_v25 }
 0x2eb   : > { %v311_v28 = vadd.s32 %v310_v26, %v308_v27 }
 0x2ed   : > { %v317_v29 = vadd.s32 10, %v311_v28  ;;  %v312_v30 = vadd.s32 5, %v311_v28 }
 0x2ef   : > { %vm318_vm6 = vcmp.eq.s32.totalorder %v288_v10, %v317_v29  ;;  %vm313_vm7 = vcmp.eq.s32.totalorder %v288_v10, %v312_v30 }
 0x2f0   : > { %v319_v31 = vsel %vm318_vm6, %v284_v13, 0.0  ;;  %v314_v32 = vsel %vm313_vm7, %v284_v13, 0.0 }
 0x2f1   : > { %320 = vadd.xlane.f32.xlu0 %v319_v31  ;;  %315 = vadd.xlane.f32.xlu1 %v314_v32 }
 0x37e   : > { %v321_v33 = vpop.xlane.xlu0 %320  ;;  %v316_v34 = vpop.xlane.xlu1 %315 }
 0x37f   : > { %v325_v35 = vsel %vm322_vm8, %v316_v34, %v284_v13 }
 0x380   : > { %v329_v36 = vsel %vm326_vm9, %v321_v33, %v325_v35 }
 0x381   : > { %330 = vst [vmem:[%s200_s25] sm:$0xff] %v329_v36 }
 0x382   : > { %596 = shalt.err (!%p593_p7)
}
 0x383   : > { %s597_s29 = scalar_lea.hbm %s842_s9, 128  ;;  %s601_s22 = scalar_lea.hbm %s889_s3, 256 }
 0x384   : > { %p598_p9 = scmp.ne.s32.totalorder %s842_s9, %s597_s29  ;;  %p602_p0 = scmp.lt.u32.totalorder %s842_s9, %s889_s3 }
 0x385   : > { %p603_p11 = scmp.lt.u32.totalorder %s601_s22, %s597_s29  ;;  %p605_p4 = scmp.lt.u32.totalorder %s597_s29, %s842_s9 }
 0x386   : > { %p599_p2 = pnand %p598_p9, %p774_p12 }
 0x387   : > { %p604_p1 = por %p603_p11, %p602_p0 }
 0x388   : > { %p600_p5 = pneg %p599_p2 }
 0x389   : > { %p606_p6 = por %p605_p4, %p604_p1 }
 0x38b   : > { %p607_p8 = pnand %p606_p6, %p600_p5 }
 0x38d   : > { %610 = shalt.err (!%p607_p8)
}
 0x38e   : > { %469 = dma.vmem_to_hbm [thread:$0]  (%p774_p12), %s844_s26, 128, %s842_s9, %s332_s16  }
 0x38f PF: > { %s357_s18 = sand.u32 1, %s641_s12   ;;  %p904_p10 = scmp.ne.s32.totalorder %s894_s19, 0 }
 0x390   : > { %p905_p13 = scmp.ge.s32.totalorder %s653_s15, 2  ;;  %s358_s20 = scalar_lea.sflag [#allocation4], %s357_s18 }
 0x392   : > { %p480_p3 = pnand %p905_p13, %p904_p10 }
 0x394   : > { %636 = dma.done.wait (!%p480_p3), %s358_s20, 128  }
 0x395   : > { %638 = vsyncadd (!%p480_p3), %s358_s20, 4294967168  ;;  %p17_p7 = scmp.ge.s32.totalorder %s739_s24, 4   ;;  %s906_s12 = smov %s645_s13 }
 0x396   : > { %s907_s13 = smov %s649_s14  ;;  %s908_s14 = smov %s770_s17 }
 0x397   : > { %s909_s15 = smov %s739_s24  ;;  %19 = sbr.rel (!%p17_p7) target bundleno = 6 (0x6), region = 81 }
 0x39e   :  { %363 = vsyncpa [#allocation3], 1 }
 0x39f   :  { %365 = vsyncpa [#allocation3 + $0x1], 1 }
 0x3a0   :  { %366 = vsyncpa [#allocation6], 1 }
 0x3a1   :  { %367 = vsyncpa [#allocation4], 1 }
 0x3a2   :  { %369 = vsyncpa [#allocation4 + $0x1], 1 }

</bundles_post_ra>
